<compile_context>
chip_gen: v7x
topology: tpu7x:2x2x1
jax: 0.10.0
libtpu: 0.0.40
codegen_flags: <defaults>
</compile_context>

<pallas_src>
import functools
import math

import jax
import jax.numpy as jnp
from jax import lax
from jax.experimental import pallas as pl
from jax.experimental.pallas import tpu as pltpu

LANES = 128
SUBLANES = 8


def _detect_num_tensorcores():
    """Return 2 on chips exposing 2 TensorCores per device (e.g. v7x), else 1."""
    try:
        dev = jax.devices()[0]
        nc = getattr(dev, "num_cores", None)
        if isinstance(nc, int) and nc >= 2:
            return 2
        kind = str(getattr(dev, "device_kind", "")).lower()
        if "v7" in kind:
            return 2
    except Exception:
        pass
    return 1


def _silog_kernel(pred_ref, tgt_ref, s1_ref, s2_ref, cnt_ref, *,
                  rows, block_rows, tiles_per_split, has_edge):
    c = pl.program_id(0)   # megacore split (parallel)
    i = pl.program_id(1)   # reduction over row tiles (arbitrary)

    @pl.when(i == 0)
    def _init():
        s1_ref[...] = jnp.zeros_like(s1_ref)
        s2_ref[...] = jnp.zeros_like(s2_ref)
        cnt_ref[...] = jnp.zeros_like(cnt_ref)

    t = tgt_ref[...].astype(jnp.float32)
    p = pred_ref[...].astype(jnp.float32)

    def accumulate(valid):
        # Clamp masked entries to 1.0 so log() stays finite; masked lanes then
        # contribute exactly log(1) - log(1) == 0, so no outer select is needed.
        t_safe = jnp.where(valid, t, 1.0)
        p_safe = jnp.where(valid, p, 1.0)
        diff = jnp.log(t_safe) - jnp.log(p_safe)

        # Pure-VPU partial reduction into vreg-shaped (8,128) accumulators.
        nsub = block_rows // SUBLANES
        d3 = diff.reshape(nsub, SUBLANES, LANES)
        v3 = valid.astype(jnp.float32).reshape(nsub, SUBLANES, LANES)

        s1_ref[...] += jnp.sum(d3, axis=0)[None, :, :]
        s2_ref[...] += jnp.sum(d3 * d3, axis=0)[None, :, :]
        cnt_ref[...] += jnp.sum(v3, axis=0)[None, :, :]

    if has_edge:
        # Only the partial last tile of each split (and clamped duplicate tiles)
        # pay for the row-bound mask; interior tiles take the lean path.
        tile_start = (c * tiles_per_split + i) * block_rows
        is_edge = (tile_start + block_rows) > rows

        @pl.when(jnp.logical_not(is_edge))
        def _interior():
            accumulate(t > 0.0)

        @pl.when(is_edge)
        def _edge():
            row_in_tile = lax.broadcasted_iota(jnp.int32, t.shape, 0)
            in_bounds = (tile_start + row_in_tile) < rows
            accumulate((t > 0.0) & in_bounds)
    else:
        # Statically known: every tile is fully in-bounds (no clamped duplicates).
        accumulate(t > 0.0)


def silog_loss(pred, target, variance_focus=0.85, block_rows=None, num_splits=None):
    """SiLog loss: sqrt(E[d^2] - vf * E[d]^2) * 10, d = log(target) - log(pred),
    over elements where target > 0.  Matches the PyTorch SiLogLoss forward."""
    assert pred.shape == target.shape
    n = int(math.prod(pred.shape))

    pred_f = jnp.ravel(pred)
    tgt_f = jnp.ravel(target)

    # Keep rows a multiple of 8 so each tile reshapes cleanly to (k, 8, 128).
    chunk = SUBLANES * LANES  # 1024
    n_pad = pl.cdiv(n, chunk) * chunk
    if n_pad != n:
        # Rare fallback (numel not a multiple of 1024): pad with target=0 -> invalid
        # (excluded), pred=1 -> log-safe.  Common depth-map shapes are copy-free.
        pad = n_pad - n
        pred_f = jnp.concatenate([pred_f, jnp.ones((pad,), pred_f.dtype)])
        tgt_f = jnp.concatenate([tgt_f, jnp.zeros((pad,), tgt_f.dtype)])

    rows = n_pad // LANES
    pred2d = pred_f.reshape(rows, LANES)
    tgt2d = tgt_f.reshape(rows, LANES)

    itemsize_p = int(jnp.dtype(pred.dtype).itemsize)
    itemsize_t = int(jnp.dtype(target.dtype).itemsize)
    max_itemsize = max(itemsize_p, itemsize_t)

    if block_rows is None:
        # ~2 MiB per input tile: 8192 rows for <=2-byte dtypes, 4096 for 4-byte.
        block_rows = 8192 if max_itemsize <= 2 else 4096

    block_rows = max(SUBLANES, (block_rows // SUBLANES) * SUBLANES)
    block_rows = min(block_rows, rows)
    num_tiles = pl.cdiv(rows, block_rows)

    if num_splits is None:
        num_splits = _detect_num_tensorcores()
    num_splits = max(1, min(int(num_splits), 2, num_tiles))

    # Keep both TensorCores busy on 2-TC chips: prefer >=4 tiles per split over
    # a single huge tile that starves the second core.
    if num_splits > 1:
        while num_tiles < 4 * num_splits and block_rows > 64:
            block_rows = max(SUBLANES, (block_rows // 2 // SUBLANES) * SUBLANES)
            num_tiles = pl.cdiv(rows, block_rows)

    tiles_per_split = pl.cdiv(num_tiles, num_splits)
    # Edge handling is only emitted when some tile can run past `rows` (partial
    # last tile, or clamped duplicate tiles from uneven splitting).
    has_edge = (rows % block_rows != 0) or (num_splits * tiles_per_split != num_tiles)

    def in_map(c, i):
        # Clamp so the block start always stays a valid block index; clamped
        # (duplicate) tiles are fully masked out in-kernel via the row-bound check.
        return (jnp.minimum(c * tiles_per_split + i, num_tiles - 1), 0)

    kernel = functools.partial(
        _silog_kernel, rows=rows, block_rows=block_rows,
        tiles_per_split=tiles_per_split, has_edge=has_edge)

    part_shape = jax.ShapeDtypeStruct((num_splits, SUBLANES, LANES), jnp.float32)
    part_spec = pl.BlockSpec((1, SUBLANES, LANES), lambda c, i: (c, 0, 0))

    # 2 inputs x double-buffered tiles in flight; keep the scoped limit well under
    # v7x's 64 MiB physical VMEM, but above v5e's 16 MiB scoped default.
    tile_bytes = block_rows * LANES * max_itemsize
    vmem_limit = int(min(max(4 * tile_bytes * 2, 32 << 20), 48 << 20))

    cost = pl.CostEstimate(
        flops=8 * n,
        transcendentals=2 * n,
        bytes_accessed=n * (itemsize_p + itemsize_t),
    )

    s1, s2, cnt = pl.pallas_call(
        kernel,
        out_shape=(part_shape, part_shape, part_shape),
        grid_spec=pltpu.PrefetchScalarGridSpec(
            num_scalar_prefetch=0,
            grid=(num_splits, tiles_per_split),
            in_specs=[
                pl.BlockSpec((block_rows, LANES), in_map),
                pl.BlockSpec((block_rows, LANES), in_map),
            ],
            out_specs=(part_spec, part_spec, part_spec),
        ),
        compiler_params=pltpu.CompilerParams(
            dimension_semantics=("parallel", "arbitrary"),
            vmem_limit_bytes=vmem_limit),
        cost_estimate=cost,
    )(pred2d, tgt2d)

    # Tiny epilogue: one cross-lane/cross-split reduce + scalar math in XLA.
    # Note: n_valid == 0 yields NaN, matching the PyTorch reference behavior.
    n_valid = jnp.sum(cnt)
    m1 = jnp.sum(s1) / n_valid
    m2 = jnp.sum(s2) / n_valid
    # Clamp guards against tiny negative values from f32 rounding (documented
    # difference: the reference would produce NaN from sqrt of a tiny negative).
    return jnp.sqrt(jnp.maximum(m2 - variance_focus * m1 * m1, 0.0)) * 10.0


def silog_loss_ref(pred, target, variance_focus=0.85):
    pred = pred.astype(jnp.float32)
    target = target.astype(jnp.float32)
    mask = target > 0
    d = jnp.where(mask, jnp.log(jnp.where(mask, target, 1.0))
                  - jnp.log(jnp.where(mask, pred, 1.0)), 0.0)
    n = jnp.sum(mask)
    m1 = jnp.sum(d) / n
    m2 = jnp.sum(d * d) / n
    return jnp.sqrt(m2 - variance_focus * m1 * m1) * 10.0


if __name__ == "__main__":
    # variance_focus comes from args in the PyTorch module
    VARIANCE_FOCUS = 0.85

    key = jax.random.PRNGKey(0)
    k1, k2, k3 = jax.random.split(key, 3)

    # --- Main check: NCHW depth maps, copy-free path, default tiling --------
    B, C, H, W = 2, 1, 32, 32
    pred = jax.random.uniform(k1, (B, C, H, W), jnp.float32, 0.1, 10.0)
    target = jax.random.uniform(k2, (B, C, H, W), jnp.float32, 0.0, 10.0)
    invalid = jax.random.bernoulli(k3, 0.3, (B, C, H, W))      # invalid depth pixels
    target = jnp.where(invalid, 0.0, target)

    loss = silog_loss(pred, target, variance_focus=VARIANCE_FOCUS)
    jax.block_until_ready(loss)
    ref = silog_loss_ref(pred, target, variance_focus=VARIANCE_FOCUS)
    assert jnp.allclose(loss, ref, rtol=1e-4, atol=1e-4), (loss, ref)

    # --- Edge-tile + 2-split check: rows not a multiple of block_rows -------
    pred_e = jax.random.uniform(k1, (2, 1, 32, 48), jnp.float32, 0.1, 10.0)
    target_e = jax.random.uniform(k2, (2, 1, 32, 48), jnp.float32, 0.0, 10.0)
    target_e = jnp.where(jax.random.bernoulli(k3, 0.3, target_e.shape), 0.0, target_e)
    loss_e = silog_loss(pred_e, target_e, variance_focus=VARIANCE_FOCUS,
                        block_rows=16, num_splits=2)
    jax.block_until_ready(loss_e)
    ref_e = silog_loss_ref(pred_e, target_e, variance_focus=VARIANCE_FOCUS)
    assert jnp.allclose(loss_e, ref_e, rtol=1e-4, atol=1e-4), (loss_e, ref_e)

    # --- bf16 input check (kernel upcasts on load) ---------------------------
    loss_b = silog_loss(pred.astype(jnp.bfloat16), target.astype(jnp.bfloat16),
                        variance_focus=VARIANCE_FOCUS)
    jax.block_until_ready(loss_b)
    ref_b = silog_loss_ref(pred.astype(jnp.bfloat16), target.astype(jnp.bfloat16),
                           variance_focus=VARIANCE_FOCUS)
    assert jnp.allclose(loss_b, ref_b, rtol=1e-3, atol=1e-3), (loss_b, ref_b)

    print("KERNEL_OK")
</pallas_src>

<mosaic_0001>
module attributes {stable_mosaic.version = 11 : i64} {
  func.func @_silog_kernel(%arg0: i32, %arg1: i32, %arg2: memref<16x128xf32, #tpu.memory_space<vmem>>, %arg3: memref<16x128xf32, #tpu.memory_space<vmem>>, %arg4: memref<1x8x128xf32, #tpu.memory_space<vmem>>, %arg5: memref<1x8x128xf32, #tpu.memory_space<vmem>>, %arg6: memref<1x8x128xf32, #tpu.memory_space<vmem>>) attributes {dimension_semantics = [#tpu.dimension_semantics<parallel>, #tpu.dimension_semantics<arbitrary>], iteration_bounds = array<i64: 1, 1>, scalar_prefetch = 0 : i64, scratch_operands = 0 : i64, tpu.core_type = #tpu.core_type<tc>, window_params = [{transform_indices = @transform_0, window_bounds = array<i64: 16, 128>}, {transform_indices = @transform_1, window_bounds = array<i64: 16, 128>}, {transform_indices = @transform_2, window_bounds = array<i64: 1, 8, 128>}, {transform_indices = @transform_3, window_bounds = array<i64: 1, 8, 128>}, {transform_indices = @transform_4, window_bounds = array<i64: 1, 8, 128>}]} {
    %c0_i32 = arith.constant 0 : i32
    %0 = arith.cmpi eq, %arg1, %c0_i32 : i32
    %1 = arith.extui %0 : i1 to i32
    %c0_i32_0 = arith.constant 0 : i32
    %2 = arith.cmpi ne, %1, %c0_i32_0 : i32
    scf.if %2 {
      %cst_27 = arith.constant 0.000000e+00 : f32
      %34 = vector.broadcast %cst_27 : f32 to vector<1x8x128xf32>
      %c0_28 = arith.constant 0 : index
      %c0_29 = arith.constant 0 : index
      %c0_30 = arith.constant 0 : index
      %35 = vector.load %arg4[%c0_28, %c0_29, %c0_30] : memref<1x8x128xf32, #tpu.memory_space<vmem>>, vector<1x8x128xf32>
      tpu.vector_store %arg4[%c0_28, %c0_29, %c0_30], %34 {strides = array<i32>} : memref<1x8x128xf32, #tpu.memory_space<vmem>>, vector<1x8x128xf32>,
      %cst_31 = arith.constant 0.000000e+00 : f32
      %36 = vector.broadcast %cst_31 : f32 to vector<1x8x128xf32>
      %c0_32 = arith.constant 0 : index
      %c0_33 = arith.constant 0 : index
      %c0_34 = arith.constant 0 : index
      %37 = vector.load %arg5[%c0_32, %c0_33, %c0_34] : memref<1x8x128xf32, #tpu.memory_space<vmem>>, vector<1x8x128xf32>
      tpu.vector_store %arg5[%c0_32, %c0_33, %c0_34], %36 {strides = array<i32>} : memref<1x8x128xf32, #tpu.memory_space<vmem>>, vector<1x8x128xf32>,
      %cst_35 = arith.constant 0.000000e+00 : f32
      %38 = vector.broadcast %cst_35 : f32 to vector<1x8x128xf32>
      %c0_36 = arith.constant 0 : index
      %c0_37 = arith.constant 0 : index
      %c0_38 = arith.constant 0 : index
      %39 = vector.load %arg6[%c0_36, %c0_37, %c0_38] : memref<1x8x128xf32, #tpu.memory_space<vmem>>, vector<1x8x128xf32>
      tpu.vector_store %arg6[%c0_36, %c0_37, %c0_38], %38 {strides = array<i32>} : memref<1x8x128xf32, #tpu.memory_space<vmem>>, vector<1x8x128xf32>,
    } else {
    }
    %c0 = arith.constant 0 : index
    %c0_1 = arith.constant 0 : index
    %3 = vector.load %arg3[%c0, %c0_1] : memref<16x128xf32, #tpu.memory_space<vmem>>, vector<16x128xf32>
    %c0_2 = arith.constant 0 : index
    %c0_3 = arith.constant 0 : index
    %4 = vector.load %arg2[%c0_2, %c0_3] : memref<16x128xf32, #tpu.memory_space<vmem>>, vector<16x128xf32>
    %cst = arith.constant 0.000000e+00 : f32
    %5 = vector.broadcast %cst : f32 to vector<16x128xf32>
    %6 = arith.cmpf ogt, %3, %5 : vector<16x128xf32>
    %cst_4 = arith.constant 1.000000e+00 : f32
    %7 = vector.broadcast %cst_4 : f32 to vector<16x128xf32>
    %8 = arith.select %6, %3, %7 : vector<16x128xi1>, vector<16x128xf32>
    %cst_5 = arith.constant 1.000000e+00 : f32
    %9 = vector.broadcast %cst_5 : f32 to vector<16x128xf32>
    %10 = arith.select %6, %4, %9 : vector<16x128xi1>, vector<16x128xf32>
    %11 = math.log %8 : vector<16x128xf32>
    %12 = math.log %10 : vector<16x128xf32>
    %13 = arith.subf %11, %12 : vector<16x128xf32>
    %14 = vector.shape_cast %13 : vector<16x128xf32> to vector<2x8x128xf32>
    %15 = arith.extui %6 : vector<16x128xi1> to vector<16x128xi32>
    %16 = arith.sitofp %15 : vector<16x128xi32> to vector<16x128xf32>
    %17 = vector.shape_cast %16 : vector<16x128xf32> to vector<2x8x128xf32>
    %c0_6 = arith.constant 0 : index
    %c0_7 = arith.constant 0 : index
    %c0_8 = arith.constant 0 : index
    %18 = vector.load %arg4[%c0_6, %c0_7, %c0_8] : memref<1x8x128xf32, #tpu.memory_space<vmem>>, vector<1x8x128xf32>
    %cst_9 = arith.constant dense<0.000000e+00> : vector<8x128xf32>
    %19 = vector.multi_reduction <add>, %14, %cst_9 [0] : vector<2x8x128xf32> to vector<8x128xf32>
    %20 = vector.shape_cast %19 : vector<8x128xf32> to vector<1x8x128xf32>
    %21 = arith.addf %18, %20 : vector<1x8x128xf32>
    %c0_10 = arith.constant 0 : index
    %c0_11 = arith.constant 0 : index
    %c0_12 = arith.constant 0 : index
    %22 = vector.load %arg4[%c0_10, %c0_11, %c0_12] : memref<1x8x128xf32, #tpu.memory_space<vmem>>, vector<1x8x128xf32>
    tpu.vector_store %arg4[%c0_10, %c0_11, %c0_12], %21 {strides = array<i32>} : memref<1x8x128xf32, #tpu.memory_space<vmem>>, vector<1x8x128xf32>,
    %c0_13 = arith.constant 0 : index
    %c0_14 = arith.constant 0 : index
    %c0_15 = arith.constant 0 : index
    %23 = vector.load %arg5[%c0_13, %c0_14, %c0_15] : memref<1x8x128xf32, #tpu.memory_space<vmem>>, vector<1x8x128xf32>
    %24 = arith.mulf %14, %14 : vector<2x8x128xf32>
    %cst_16 = arith.constant dense<0.000000e+00> : vector<8x128xf32>
    %25 = vector.multi_reduction <add>, %24, %cst_16 [0] : vector<2x8x128xf32> to vector<8x128xf32>
    %26 = vector.shape_cast %25 : vector<8x128xf32> to vector<1x8x128xf32>
    %27 = arith.addf %23, %26 : vector<1x8x128xf32>
    %c0_17 = arith.constant 0 : index
    %c0_18 = arith.constant 0 : index
    %c0_19 = arith.constant 0 : index
    %28 = vector.load %arg5[%c0_17, %c0_18, %c0_19] : memref<1x8x128xf32, #tpu.memory_space<vmem>>, vector<1x8x128xf32>
    tpu.vector_store %arg5[%c0_17, %c0_18, %c0_19], %27 {strides = array<i32>} : memref<1x8x128xf32, #tpu.memory_space<vmem>>, vector<1x8x128xf32>,
    %c0_20 = arith.constant 0 : index
    %c0_21 = arith.constant 0 : index
    %c0_22 = arith.constant 0 : index
    %29 = vector.load %arg6[%c0_20, %c0_21, %c0_22] : memref<1x8x128xf32, #tpu.memory_space<vmem>>, vector<1x8x128xf32>
    %cst_23 = arith.constant dense<0.000000e+00> : vector<8x128xf32>
    %30 = vector.multi_reduction <add>, %17, %cst_23 [0] : vector<2x8x128xf32> to vector<8x128xf32>
    %31 = vector.shape_cast %30 : vector<8x128xf32> to vector<1x8x128xf32>
    %32 = arith.addf %29, %31 : vector<1x8x128xf32>
    %c0_24 = arith.constant 0 : index
    %c0_25 = arith.constant 0 : index
    %c0_26 = arith.constant 0 : index
    %33 = vector.load %arg6[%c0_24, %c0_25, %c0_26] : memref<1x8x128xf32, #tpu.memory_space<vmem>>, vector<1x8x128xf32>
    tpu.vector_store %arg6[%c0_24, %c0_25, %c0_26], %32 {strides = array<i32>} : memref<1x8x128xf32, #tpu.memory_space<vmem>>, vector<1x8x128xf32>,
    return
  }
  func.func @transform_0(%arg0: i32, %arg1: i32) -> (i32, i32) {
    %c1_i32 = arith.constant 1 : i32
    %0 = arith.muli %arg0, %c1_i32 : i32
    %1 = arith.addi %0, %arg1 : i32
    %c0_i32 = arith.constant 0 : i32
    %2 = arith.minsi %1, %c0_i32 : i32
    %c0_i32_0 = arith.constant 0 : i32
    %c0_i32_1 = arith.constant 0 : i32
    return %2, %c0_i32_0 : i32, i32
  }
  func.func @transform_1(%arg0: i32, %arg1: i32) -> (i32, i32) {
    %c1_i32 = arith.constant 1 : i32
    %0 = arith.muli %arg0, %c1_i32 : i32
    %1 = arith.addi %0, %arg1 : i32
    %c0_i32 = arith.constant 0 : i32
    %2 = arith.minsi %1, %c0_i32 : i32
    %c0_i32_0 = arith.constant 0 : i32
    %c0_i32_1 = arith.constant 0 : i32
    return %2, %c0_i32_0 : i32, i32
  }
  func.func @transform_2(%arg0: i32, %arg1: i32) -> (i32, i32, i32) {
    %c0_i32 = arith.constant 0 : i32
    %c0_i32_0 = arith.constant 0 : i32
    %c0_i32_1 = arith.constant 0 : i32
    return %arg0, %c0_i32, %c0_i32_0 : i32, i32, i32
  }
  func.func @transform_3(%arg0: i32, %arg1: i32) -> (i32, i32, i32) {
    %c0_i32 = arith.constant 0 : i32
    %c0_i32_0 = arith.constant 0 : i32
    %c0_i32_1 = arith.constant 0 : i32
    return %arg0, %c0_i32, %c0_i32_0 : i32, i32, i32
  }
  func.func @transform_4(%arg0: i32, %arg1: i32) -> (i32, i32, i32) {
    %c0_i32 = arith.constant 0 : i32
    %c0_i32_0 = arith.constant 0 : i32
    %c0_i32_1 = arith.constant 0 : i32
    return %arg0, %c0_i32, %c0_i32_0 : i32, i32, i32
  }
}

</mosaic_0001>

<bundles_post_ra>
// kernel: tpu_custom_call.1
= control target key start
LH: loop header
LB: loop body
LE: loop exit
PB: predicated region body
PF: predicated region fallthrough
CT: control target
= control target key end

     0   :  { %10 = vsyncpa [#allocation3], 0  ;;  %s392_s0 = inlined_call_operand.hbm [shape: f32[16,128], index: 0, kind: input, shape index: {}]   ;;  %s393_s1 = inlined_call_operand.hbm [shape: f32[16,128], index: 1, kind: input, shape index: {}]   ;;  %s394_s2 = inlined_call_operand.hbm [shape: f32[1,8,128], index: 2, kind: output, shape index: {0}]   ;;  %s395_s3 = inlined_call_operand.hbm [shape: f32[1,8,128], index: 3, kind: output, shape index: {1}]   ;;  %s396_s4 = inlined_call_operand.hbm [shape: f32[1,8,128], index: 4, kind: output, shape index: {2}]  }
   0x1   :  { %11 = vsyncpa [#allocation6], 0 }
   0x2   :  { %12 = vsyncpa [#allocation4], 0 }
   0x3   :  { %13 = vsyncpa [#allocation9], 0  ;;  %s292_s15 = smov [#allocation2]   ;;  %s174_s19 = scalar_lea.hbm %s392_s0, 256 }
   0x4   :  { %s25_s16 = sshll.u32 %s292_s15, 4  ;;  %p175_p0 = scmp.ne.s32.totalorder %s392_s0, %s174_s19  ;;  %s26_s16 = int_to_ptr.vmem [resolvable:$true] %s25_s16 }
   0x5   :  { %p178_p1 = scmp.lt.u32.totalorder %s174_s19, %s392_s0 }
   0x7   :  { %p180_p2 = pnand %p178_p1, %p175_p0 }
   0x9   :  { %183 = shalt.err (!%p180_p2)
}
   0xa   :  { %s184_s24 = scalar_lea.vmem %s26_s16, 256  ;;  %p189_p4 = scmp.lt.s32.totalorder %s26_s16, %s26_s16 }
   0xb   :  { %p185_p3 = scmp.ne.s32.totalorder %s26_s16, %s184_s24  ;;  %p190_p5 = scmp.lt.s32.totalorder %s184_s24, %s184_s24 }
   0xd   :  { %p191_p6 = por %p190_p5, %p189_p4 }
   0xf   :  { %p192_p7 = pnand %p191_p6, %p185_p3 }
  0x11   :  { %195 = shalt.err (!%p192_p7)
}
  0x12   :  { %s293_s25 = smov 128   ;;  %s294_s26 = smov 8  }
  0x13   :  { %31 = dma.hbm_to_vmem [thread:$0]  %s392_s0, 256, %s26_s16, [#allocation3], %s293_s25, %s293_s25, %s294_s26  }
  0x14   :  { %s295_s29 = smov [#allocation5]   ;;  %s196_s7 = scalar_lea.hbm %s393_s1, 256 }
  0x15   :  { %s43_s30 = sshll.u32 %s295_s29, 4  ;;  %p197_p8 = scmp.ne.s32.totalorder %s393_s1, %s196_s7  ;;  %s44_s30 = int_to_ptr.vmem [resolvable:$true] %s43_s30 }
  0x16   :  { %p200_p9 = scmp.lt.u32.totalorder %s196_s7, %s393_s1 }
  0x18   :  { %p202_p10 = pnand %p200_p9, %p197_p8 }
  0x1a   :  { %205 = shalt.err (!%p202_p10)
}
  0x1b   :  { %s206_s12 = scalar_lea.vmem %s44_s30, 256  ;;  %p211_p12 = scmp.lt.s32.totalorder %s44_s30, %s44_s30 }
  0x1c   :  { %p207_p11 = scmp.ne.s32.totalorder %s44_s30, %s206_s12  ;;  %p212_p13 = scmp.lt.s32.totalorder %s206_s12, %s206_s12 }
  0x1e   :  { %p213_p0 = por %p212_p13, %p211_p12 }
  0x20   :  { %p214_p1 = pnand %p213_p0, %p207_p11 }
  0x22   :  { %217 = shalt.err (!%p214_p1)
}
  0x23   :  { %49 = dma.hbm_to_vmem [thread:$0]  %s393_s1, 256, %s44_s30, [#allocation6], %s293_s25, %s293_s25, %s294_s26  }
  0x24   :  { %284 = dma.done.wait [#allocation3], 256  }
  0x25   :  { %285 = vsyncadd [#allocation3], 4294967040 }
  0x26   :  { %286 = dma.done.wait [#allocation6], 256  }
  0x27   :  { %287 = vsyncadd [#allocation6], 4294967040  ;;  %v71_v0 = vld [vmem:[#allocation5] sm:$0xff]  ;;  %v72_v1 = vld [vmem:[#allocation5 + $0x8] sm:$0xff]  ;;  %v296_v8 = vmov 0.0   ;;  %s297_s1 = smov [#allocation7]  }
  0x28   :  { %v73_v2 = vld [vmem:[#allocation2] sm:$0xff]  ;;  %v74_v3 = vld [vmem:[#allocation2 + $0x8] sm:$0xff]  ;;  %vm75_vm0 = vcmp.gt.f32.partialorder %v71_v0, 0.0  ;;  %vm76_vm1 = vcmp.gt.f32.partialorder %v72_v1, 0.0  ;;  %s115_s14 = sshll.u32 %s297_s1, 4  ;;  %s298_s15 = smov [#allocation8]   ;;  %s116_s14 = int_to_ptr.vmem [resolvable:$true] %s115_s14 }
  0x29   :  { %v77_v4 = vsel %vm75_vm0, %v71_v0, 1.0  ;;  %v78_v5 = vsel %vm76_vm1, %v72_v1, 1.0  ;;  %v79_v6 = vsel %vm75_vm0, %v73_v2, 1.0  ;;  %v80_v7 = vsel %vm76_vm1, %v74_v3, 1.0  ;;  %s125_s16 = sshll.u32 %s298_s15, 4  ;;  %s299_s17 = smov [#allocation10]   ;;  %s126_s16 = int_to_ptr.vmem [resolvable:$true] %s125_s16 }
  0x2a   :  { %166 = vlog2.f32 %v77_v4  ;;  %v156_v9 = vsel %vm75_vm0, 1.0, %v296_v8  ;;  %v157_v10 = vsel %vm76_vm1, 1.0, %v296_v8  ;;  %s135_s18 = sshll.u32 %s299_s17, 4  ;;  %s218_s19 = scalar_lea.vmem %s116_s14, 128  ;;  %s349_s18 = int_to_ptr.vmem [resolvable:$true] %s135_s18 }
  0x2b   :  { %168 = vlog2.f32 %v78_v5  ;;  %v106_v11 = vadd.f32 %v157_v10, %v156_v9  ;;  %p219_p2 = scmp.ne.s32.totalorder %s116_s14, %s218_s19  ;;  %p223_p3 = scmp.lt.s32.totalorder %s116_s14, %s116_s14 }
  0x2c   :  { %170 = vlog2.f32 %v79_v6  ;;  %p224_p4 = scmp.lt.s32.totalorder %s218_s19, %s218_s19 }
  0x2d   :  { %172 = vlog2.f32 %v80_v7  ;;  %108 = vst [vmem:[#allocation10] sm:$0xff] %v106_v11 }
  0x2e   :  { %p225_p5 = por %p224_p4, %p223_p3 }
  0x30   :  { %p226_p6 = pnand %p225_p5, %p219_p2 }
  0x34   :  { %v167_v12 = vpop.eup %166 }
  0x35   :  { %v169_v13 = vpop.eup %168  ;;  %v82_v14 = vmul.f32 0.6931472, %v167_v12 }
  0x36   :  { %v171_v15 = vpop.eup %170  ;;  %v84_v16 = vmul.f32 0.6931472, %v169_v13 }
  0x37   :  { %v173_v17 = vpop.eup %172  ;;  %v86_v18 = vmul.f32 0.6931472, %v171_v15 }
  0x38   :  { %v88_v19 = vmul.f32 0.6931472, %v173_v17 }
  0x39   :  { %v89_v20 = vsub.f32 %v82_v14, %v86_v18 }
  0x3a   :  { %v90_v21 = vsub.f32 %v84_v16, %v88_v19 }
  0x3b   :  { %v100_v22 = vmul.f32 %v89_v20, %v89_v20 }
  0x3c   :  { %v101_v23 = vmul.f32 %v90_v21, %v90_v21  ;;  %v96_v24 = vadd.f32 %v90_v21, %v89_v20 }
  0x3e   :  { %v102_v25 = vadd.f32 %v101_v23, %v100_v22  ;;  %98 = vst [vmem:[#allocation7] sm:$0xff] %v96_v24 }
  0x3f   :  { %229 = shalt.err (!%p226_p6)
}
  0x40   :  { %s230_s22 = scalar_lea.hbm %s394_s2, 128 }
  0x41   :  { %p231_p7 = scmp.ne.s32.totalorder %s394_s2, %s230_s22  ;;  %p234_p8 = scmp.lt.u32.totalorder %s230_s22, %s394_s2 }
  0x43   :  { %p236_p9 = pnand %p234_p8, %p231_p7 }
  0x45   :  { %239 = shalt.err (!%p236_p9)
}
  0x46   :  { %118 = dma.vmem_to_hbm [thread:$0]  %s116_s14, 128, %s394_s2, [#allocation4]   ;;  %104 = vst [vmem:[#allocation8] sm:$0xff] %v102_v25 }
  0x47   :  { %s240_s29 = scalar_lea.vmem %s126_s16, 128  ;;  %p245_p11 = scmp.lt.s32.totalorder %s126_s16, %s126_s16 }
  0x48   :  { %p241_p10 = scmp.ne.s32.totalorder %s126_s16, %s240_s29  ;;  %p246_p12 = scmp.lt.s32.totalorder %s240_s29, %s240_s29 }
  0x4a   :  { %p247_p13 = por %p246_p12, %p245_p11 }
  0x4c   :  { %p248_p0 = pnand %p247_p13, %p241_p10 }
  0x4e   :  { %251 = shalt.err (!%p248_p0)
}
  0x4f   :  { %s252_s6 = scalar_lea.hbm %s395_s3, 128 }
  0x50   :  { %p253_p1 = scmp.ne.s32.totalorder %s395_s3, %s252_s6  ;;  %p256_p2 = scmp.lt.u32.totalorder %s252_s6, %s395_s3 }
  0x52   :  { %p258_p3 = pnand %p256_p2, %p253_p1 }
  0x54   :  { %261 = shalt.err (!%p258_p3)
}
  0x55   :  { %128 = dma.vmem_to_hbm [thread:$0]  %s126_s16, 128, %s395_s3, [#allocation9]  }
  0x56   :  { %s262_s12 = scalar_lea.vmem %s349_s18, 128  ;;  %p267_p5 = scmp.lt.s32.totalorder %s349_s18, %s349_s18 }
  0x57   :  { %p263_p4 = scmp.ne.s32.totalorder %s349_s18, %s262_s12  ;;  %p268_p6 = scmp.lt.s32.totalorder %s262_s12, %s262_s12 }
  0x59   :  { %p269_p7 = por %p268_p6, %p267_p5 }
  0x5b   :  { %p270_p8 = pnand %p269_p7, %p263_p4 }
  0x5d   :  { %273 = shalt.err (!%p270_p8)
}
  0x5e   :  { %s274_s1 = scalar_lea.hbm %s396_s4, 128 }
  0x5f   :  { %p275_p9 = scmp.ne.s32.totalorder %s396_s4, %s274_s1  ;;  %p278_p10 = scmp.lt.u32.totalorder %s274_s1, %s396_s4 }
  0x61   :  { %p280_p11 = pnand %p278_p10, %p275_p9 }
  0x63   :  { %283 = shalt.err (!%p280_p11)
}
  0x64   :  { %138 = dma.vmem_to_hbm [thread:$0]  %s349_s18, 128, %s396_s4, [#allocation9]  }
  0x65   :  { %288 = dma.done.wait [#allocation4], 128  }
  0x66   :  { %289 = vsyncadd [#allocation4], 4294967168 }
  0x67   :  { %290 = dma.done.wait [#allocation9], 256  }
  0x68   :  { %291 = vsyncadd [#allocation9], 4294967040 }
  0x69   :  { %148 = vsyncpa [#allocation3], 1 }
  0x6a   :  { %149 = vsyncpa [#allocation6], 1 }
  0x6b   :  { %150 = vsyncpa [#allocation4], 1 }
  0x6c   :  { %151 = vsyncpa [#allocation9], 1 }

</bundles_post_ra>
